<compile_context>
chip_gen: v5e
topology: v5e:2x2
jax: 0.10.0
libtpu: 0.0.40
codegen_flags: <defaults>
</compile_context>

<pallas_src>
import numpy as np
import jax
import jax.numpy as jnp
from jax.experimental import pallas as pl
from jax.experimental.pallas import tpu as pltpu


# ----------------------------------------------------------------------------
# Kernel 1: LSTM future predictor (recurrence only).
#   grid = (1,): the whole recurrence runs in-kernel, hidden/cell state live in
#   VMEM scratch, gate pre-activations (x @ W_ih + b) are precomputed.
# ----------------------------------------------------------------------------
def _lstm_kernel(xp_ref, h0_ref, whh_ref, out_ref, h_sc, c_sc):
    K = xp_ref.shape[0]
    H = h_sc.shape[-1]

    # Reference calls self._future_predictor(action, (hidden, hidden)),
    # so c0 = h0 is intentional.
    h_sc[...] = h0_ref[...]
    c_sc[...] = h0_ref[...]

    # Fully unrolled recurrence (K static & small): one MXU push per step.
    for t in range(K):
        gates = (jnp.dot(h_sc[...], whh_ref[...],
                         preferred_element_type=jnp.float32)
                 + xp_ref[t])                                   # (N, 4H) lane-dense
        # PyTorch LSTM gate order: i, f, g, o (contiguous 0:H, H:2H, ... slices)
        i_g = jax.nn.sigmoid(gates[:, 0:H])
        f_g = jax.nn.sigmoid(gates[:, H:2 * H])
        g_g = jnp.tanh(gates[:, 2 * H:3 * H])
        o_g = jax.nn.sigmoid(gates[:, 3 * H:4 * H])
        c = f_g * c_sc[...] + i_g * g_g
        h = o_g * jnp.tanh(c)
        c_sc[...] = c
        h_sc[...] = h
        out_ref[t] = h


def lstm_future_predictor(x_proj, h0, w_hh):
    """x_proj: (K, N, 4H) = x @ W_ih + (b_ih + b_hh); h0: (N, H); w_hh: (H, 4H)."""
    K, N, G = x_proj.shape
    H = h0.shape[-1]
    z3 = lambda i: (0, 0, 0)
    z2 = lambda i: (0, 0)
    return pl.pallas_call(
        _lstm_kernel,
        out_shape=jax.ShapeDtypeStruct((K, N, H), jnp.float32),
        grid_spec=pltpu.PrefetchScalarGridSpec(
            num_scalar_prefetch=0,
            grid=(1,),                       # single step: recurrence fully in-kernel
            in_specs=[
                pl.BlockSpec((K, N, G), z3),   # hoisted gate pre-activations
                pl.BlockSpec((N, H), z2),      # h0 (== c0)
                pl.BlockSpec((H, G), z2),      # W_hh
            ],
            out_specs=pl.BlockSpec((K, N, H), z3),
            scratch_shapes=[pltpu.VMEM((N, H), jnp.float32),
                            pltpu.VMEM((N, H), jnp.float32)],
        ),
        compiler_params=pltpu.CompilerParams(dimension_semantics=("arbitrary",)),
    )(x_proj, h0, w_hh)


# ----------------------------------------------------------------------------
# Kernel 2: predictor first layers + predictor MLP + BCE-with-logits losses
# + masked means + final scaled loss.  Single grid step (everything fits VMEM
# at these sizes).  At production-scale M, tile M with a ("parallel",
# "arbitrary") grid and accumulate partial sums (v7x: 2 TCs, 64 MiB VMEM).
# ----------------------------------------------------------------------------
def cpca_loss(fp_raw, pos_targets, neg_targets, valids_f,
              w0, b0, w1, wp1, bp1, wp2_row, bp2, *, loss_scale):
    M, H = fp_raw.shape
    NN, M2, P = neg_targets.shape
    assert M2 == M

    def kernel(fp_ref, pos_ref, neg_ref, valid_ref,
               w0_ref, b0_ref, w1_ref, wp1_ref, bp1_ref, wp2_ref, bp2_ref,
               out_ref):
        def softplus(x):  # stable log(1 + exp(x))
            return jnp.maximum(x, 0.0) + jnp.log1p(jnp.exp(-jnp.abs(x)))

        def predictor(x):  # ReLU -> Linear(H,H) -> ReLU -> Linear(H,1)
            h = jnp.maximum(x, 0.0)
            h = (jnp.dot(h, wp1_ref[...], preferred_element_type=jnp.float32)
                 + bp1_ref[...])
            h = jnp.maximum(h, 0.0)
            # Final (H,1) projection as VPU multiply + lane reduce (XLU) instead
            # of a 1-output-column MXU matmul.
            return jnp.sum(h * wp2_ref[...], axis=-1, keepdims=True) + bp2_ref[...]

        # first layers
        fp = (jnp.dot(fp_ref[...], w0_ref[...], preferred_element_type=jnp.float32)
              + b0_ref[...])                                        # (M, H)
        valid = valid_ref[...]                                      # (M, 1) float
        n_valid = jnp.sum(valid)

        # positive branch: BCE(target=1) = softplus(x) - x
        pos_emb = jnp.dot(pos_ref[...], w1_ref[...],
                          preferred_element_type=jnp.float32)       # (M, H)
        pos_logits = predictor(fp + pos_emb)                        # (M, 1)
        pos_sum = jnp.sum((softplus(pos_logits) - pos_logits) * valid)

        # negative branch: static loop over NN contiguous (M, P) slabs; fp and
        # valid are reused directly (no broadcast_to / reshape materialization).
        neg_sum = jnp.zeros((), jnp.float32)
        for n in range(NN):
            neg_emb = jnp.dot(neg_ref[n], w1_ref[...],
                              preferred_element_type=jnp.float32)   # (M, H)
            neg_logits = predictor(fp + neg_emb)                    # (M, 1)
            neg_sum = neg_sum + jnp.sum(softplus(neg_logits) * valid)

        # reference masked_mean semantics:
        #   pos: sum(bce*valid)/M      * (n_valid/M)
        #   neg: sum(bce*valid)/(M*NN) * (n_valid/M)
        pos_loss = (pos_sum / float(M)) * (n_valid / float(M))
        neg_loss = (neg_sum / float(M * NN)) * (n_valid / float(M))
        out_ref[...] = jnp.reshape(loss_scale * (pos_loss + neg_loss), (1, 1))

    z2 = lambda i: (0, 0)
    z3 = lambda i: (0, 0, 0)
    return pl.pallas_call(
        kernel,
        out_shape=jax.ShapeDtypeStruct((1, 1), jnp.float32),
        grid_spec=pltpu.PrefetchScalarGridSpec(
            num_scalar_prefetch=0,
            grid=(1,),
            in_specs=[
                pl.BlockSpec((M, H), z2),       # fp_raw
                pl.BlockSpec((M, P), z2),       # positive targets
                pl.BlockSpec((NN, M, P), z3),   # negative targets (NN, M, P)
                pl.BlockSpec((M, 1), z2),       # valid mask
                pl.BlockSpec((H, H), z2),       # first_layers[0] W
                pl.BlockSpec((1, H), z2),       # first_layers[0] b
                pl.BlockSpec((P, H), z2),       # first_layers[1] W (no bias)
                pl.BlockSpec((H, H), z2),       # predictor Linear(H,H) W
                pl.BlockSpec((1, H), z2),       # predictor Linear(H,H) b
                pl.BlockSpec((1, H), z2),       # predictor Linear(H,1) W as row
                pl.BlockSpec((1, 1), z2),       # predictor Linear(H,1) b
            ],
            out_specs=pl.BlockSpec((1, 1), z2),
        ),
        compiler_params=pltpu.CompilerParams(dimension_semantics=("arbitrary",)),
    )(fp_raw, pos_targets, neg_targets, valids_f,
      w0, b0, w1, wp1, bp1, wp2_row, bp2)


# ----------------------------------------------------------------------------
# Glue: masked_index_select (gathers + mask fill), plain JAX.
# ----------------------------------------------------------------------------
def masked_index_select_jnp(t, indexer, valids, fill_value=0.0):
    idx = jnp.where(valids, indexer, 0).reshape(-1).astype(jnp.int32)
    out = jnp.take(t, idx, axis=0)
    mask = valids.reshape(-1)
    out = jnp.where(mask[:, None], out, fill_value)
    return out.reshape(tuple(indexer.shape) + t.shape[1:])


if __name__ == "__main__":
    # ---- config (small shapes consistent with the module) ----
    H = 32               # hidden_size (net.output_size)
    P = 32               # input_size  (net.perception_embedding_size)
    E = 8                # action embedding size
    NUM_ACTIONS = 4
    K = 4                # prediction horizon k
    TIME_SUBSAMPLE = 2
    FUTURE_SUBSAMPLE = 2
    NUM_NEGATIVES = 4
    LOSS_SCALE = 0.1

    # ---- synthetic rnn_build_seq_info (seqs sorted by length, descending) ----
    rng = np.random.RandomState(0)
    seq_lens = np.array([8, 6], dtype=np.int64)
    n_seqs = seq_lens.shape[0]
    T = int(seq_lens.sum())
    longest = int(seq_lens.max())
    num_seqs_at_step = np.array([int(np.sum(seq_lens > t)) for t in range(longest)],
                                dtype=np.int64)
    select_inds = np.arange(T, dtype=np.int64)

    # ---- _build_inds (host-side, deterministic) ----
    start_times, seq_offsets, max_valid = [], [], []
    for i in range(n_seqs):
        L = int(seq_lens[i])
        if TIME_SUBSAMPLE >= L - 1:
            st = np.arange(1, L, dtype=np.int64)
        else:
            st = rng.permutation(L)[:TIME_SUBSAMPLE].astype(np.int64)
        start_times.append(st)
        seq_offsets.append(np.full_like(st, i))
        max_valid.append(np.full_like(st, L - 1))
    start_times = np.concatenate(start_times)
    seq_offsets = np.concatenate(seq_offsets)
    max_valid = np.concatenate(max_valid)
    N = start_times.shape[0]

    all_times = np.arange(K, dtype=np.int64)[:, None] + start_times[None, :]
    action_valids = all_times < max_valid[None, :]
    target_valids = all_times + 1 < max_valid[None, :]
    all_times = np.where(action_valids, all_times, 0)
    time_start_inds = np.cumsum(num_seqs_at_step) - num_seqs_at_step
    action_inds = time_start_inds[all_times] + seq_offsets[None, :]
    target_inds = time_start_inds[all_times + 1] + seq_offsets[None, :]
    action_inds = select_inds[action_inds]
    target_inds = select_inds[target_inds]

    # future subsample indices (torch.multinomial quirk reproduced exactly)
    if FUTURE_SUBSAMPLE < K:
        future_inds = np.stack(
            [rng.choice(K, size=FUTURE_SUBSAMPLE, replace=False) for _ in range(N)])
    else:
        future_inds = np.broadcast_to(np.arange(K)[:, None], (K, N)).copy()
    future_inds = (future_inds
                   + np.arange(0, future_inds.shape[0] * K, K)[:, None]).flatten()
    M = future_inds.shape[0]

    positive_inds = target_inds.flatten()[future_inds]
    target_valids_sel = target_valids.flatten()[future_inds]

    # negative sampling (uniform, positive index excluded, no replacement)
    neg_inds = np.empty((M, NUM_NEGATIVES), dtype=np.int64)
    for m in range(M):
        p = np.ones(T, dtype=np.float64)
        p[positive_inds[m]] = 0.0
        p /= p.sum()
        neg_inds[m] = rng.choice(T, size=NUM_NEGATIVES, replace=False, p=p)

    # ---- deterministic parameters & inputs ----
    key = jax.random.PRNGKey(0)
    ks = jax.random.split(key, 12)
    s = 0.1
    embed_table = jax.random.normal(ks[0], (NUM_ACTIONS, E), jnp.float32) * s
    w_ih = jax.random.normal(ks[1], (E, 4 * H), jnp.float32) * s   # LSTM (gates i,f,g,o)
    w_hh = jax.random.normal(ks[2], (H, 4 * H), jnp.float32) * s
    b_lstm = jnp.zeros((1, 4 * H), jnp.float32)                    # b_ih + b_hh folded host-side
    w0 = jax.random.normal(ks[3], (H, H), jnp.float32) * s         # first_layers[0]
    b0 = jnp.zeros((1, H), jnp.float32)
    w1 = jax.random.normal(ks[4], (P, H), jnp.float32) * s         # first_layers[1], no bias
    wp1 = jax.random.normal(ks[5], (H, H), jnp.float32) * s        # predictor Linear(H,H)
    bp1 = jnp.zeros((1, H), jnp.float32)
    wp2_row = jax.random.normal(ks[6], (1, H), jnp.float32) * s    # predictor Linear(H,1) W as row
    bp2 = jnp.zeros((1, 1), jnp.float32)

    rnn_output = jax.random.normal(ks[7], (T, H), jnp.float32)
    perception_embed = jax.random.normal(ks[8], (T, P), jnp.float32)
    action_ids = jax.random.randint(ks[9], (T,), 0, NUM_ACTIONS)

    # ---- forward ----
    action_emb = jnp.take(embed_table, action_ids, axis=0)                    # (T, E)
    h0 = masked_index_select_jnp(rnn_output,
                                 jnp.asarray(action_inds[0]),
                                 jnp.asarray(action_valids[0]))               # (N, H)
    act_sel = masked_index_select_jnp(action_emb,
                                      jnp.asarray(action_inds),
                                      jnp.asarray(action_valids))             # (K, N, E)

    # Hoisted LSTM input projection: one batched matmul (incl. folded biases).
    x_proj = (act_sel.reshape(K * N, E) @ w_ih + b_lstm).reshape(K, N, 4 * H)  # (K, N, 4H)

    future_preds = lstm_future_predictor(x_proj, h0, w_hh)                    # (K, N, H)

    fp_raw = future_preds.reshape(K * N, H)[jnp.asarray(future_inds)]         # (M, H)
    pos_targets = masked_index_select_jnp(perception_embed,
                                          jnp.asarray(positive_inds),
                                          jnp.asarray(target_valids_sel))     # (M, P)
    neg_targets = jnp.take(perception_embed,
                           jnp.asarray(neg_inds.reshape(-1)), axis=0)         # (M*NN, P)
    neg_targets = neg_targets.reshape(M, NUM_NEGATIVES, P).transpose(1, 0, 2)  # (NN, M, P)
    valids_f = jnp.asarray(target_valids_sel.astype(np.float32)).reshape(M, 1)

    loss = cpca_loss(fp_raw, pos_targets, neg_targets, valids_f,
                     w0, b0, w1, wp1, bp1, wp2_row, bp2,
                     loss_scale=LOSS_SCALE)
    loss = jax.block_until_ready(loss)
    assert loss.shape == (1, 1) and np.isfinite(float(loss[0, 0]))
    print("KERNEL_OK")
</pallas_src>

<mosaic_0001>
module attributes {stable_mosaic.version = 11 : i64} {
  func.func @_lstm_kernel(%arg0: i32, %arg1: memref<4x4x128xf32, #tpu.memory_space<vmem>>, %arg2: memref<4x32xf32, #tpu.memory_space<vmem>>, %arg3: memref<32x128xf32, #tpu.memory_space<vmem>>, %arg4: memref<4x4x32xf32, #tpu.memory_space<vmem>>, %arg5: memref<4x32xf32, #tpu.memory_space<vmem>>, %arg6: memref<4x32xf32, #tpu.memory_space<vmem>>) attributes {dimension_semantics = [#tpu.dimension_semantics<arbitrary>], iteration_bounds = array<i64: 1>, scalar_prefetch = 0 : i64, scratch_operands = 2 : i64, tpu.core_type = #tpu.core_type<tc>, window_params = [{pipeline_mode = #tpu.pipeline_mode<synchronous>, transform_indices = @transform_0, window_bounds = array<i64: 4, 4, 128>}, {pipeline_mode = #tpu.pipeline_mode<synchronous>, transform_indices = @transform_1, window_bounds = array<i64: 4, 32>}, {pipeline_mode = #tpu.pipeline_mode<synchronous>, transform_indices = @transform_2, window_bounds = array<i64: 32, 128>}, {pipeline_mode = #tpu.pipeline_mode<synchronous>, transform_indices = @transform_3, window_bounds = array<i64: 4, 4, 32>}]} {
    %c0 = arith.constant 0 : index
    %c0_0 = arith.constant 0 : index
    %0 = vector.load %arg2[%c0, %c0_0] : memref<4x32xf32, #tpu.memory_space<vmem>>, vector<4x32xf32>
    %c0_1 = arith.constant 0 : index
    %c0_2 = arith.constant 0 : index
    %1 = vector.load %arg5[%c0_1, %c0_2] : memref<4x32xf32, #tpu.memory_space<vmem>>, vector<4x32xf32>
    tpu.vector_store %arg5[%c0_1, %c0_2], %0 {strides = array<i32>} : memref<4x32xf32, #tpu.memory_space<vmem>>, vector<4x32xf32>,
    %c0_3 = arith.constant 0 : index
    %c0_4 = arith.constant 0 : index
    %2 = vector.load %arg2[%c0_3, %c0_4] : memref<4x32xf32, #tpu.memory_space<vmem>>, vector<4x32xf32>
    %c0_5 = arith.constant 0 : index
    %c0_6 = arith.constant 0 : index
    %3 = vector.load %arg6[%c0_5, %c0_6] : memref<4x32xf32, #tpu.memory_space<vmem>>, vector<4x32xf32>
    tpu.vector_store %arg6[%c0_5, %c0_6], %2 {strides = array<i32>} : memref<4x32xf32, #tpu.memory_space<vmem>>, vector<4x32xf32>,
    %c0_7 = arith.constant 0 : index
    %c0_8 = arith.constant 0 : index
    %4 = vector.load %arg5[%c0_7, %c0_8] : memref<4x32xf32, #tpu.memory_space<vmem>>, vector<4x32xf32>
    %c0_9 = arith.constant 0 : index
    %c0_10 = arith.constant 0 : index
    %5 = vector.load %arg3[%c0_9, %c0_10] : memref<32x128xf32, #tpu.memory_space<vmem>>, vector<32x128xf32>
    %cst = arith.constant dense<0.000000e+00> : vector<4x128xf32>
    %6 = tpu.matmul %4, %5, %cst {dimension_numbers = #tpu.dot_dimension_numbers<[1], [0], [0], [1], [0, 0, 1, 1], [], []>} : vector<4x32xf32>, vector<32x128xf32>, vector<4x128xf32> -> vector<4x128xf32>
    %c0_11 = arith.constant 0 : index
    %c0_12 = arith.constant 0 : index
    %c0_13 = arith.constant 0 : index
    %7 = vector.load %arg1[%c0_11, %c0_12, %c0_13] : memref<4x4x128xf32, #tpu.memory_space<vmem>>, vector<1x4x128xf32>
    %8 = vector.shape_cast %7 : vector<1x4x128xf32> to vector<4x128xf32>
    %9 = arith.addf %6, %8 : vector<4x128xf32>
    %10 = vector.extract_strided_slice %9 {offsets = [0, 0], sizes = [4, 32], strides = [1, 1]} : vector<4x128xf32> to vector<4x32xf32>
    %11 = arith.negf %10 : vector<4x32xf32>
    %12 = math.exp %11 : vector<4x32xf32>
    %cst_14 = arith.constant 1.000000e+00 : f32
    %13 = vector.broadcast %cst_14 : f32 to vector<4x32xf32>
    %14 = arith.addf %13, %12 : vector<4x32xf32>
    %15 = arith.divf %13, %14 : vector<4x32xf32>
    %16 = vector.extract_strided_slice %9 {offsets = [0, 32], sizes = [4, 32], strides = [1, 1]} : vector<4x128xf32> to vector<4x32xf32>
    %17 = arith.negf %16 : vector<4x32xf32>
    %18 = math.exp %17 : vector<4x32xf32>
    %cst_15 = arith.constant 1.000000e+00 : f32
    %19 = vector.broadcast %cst_15 : f32 to vector<4x32xf32>
    %20 = arith.addf %19, %18 : vector<4x32xf32>
    %21 = arith.divf %19, %20 : vector<4x32xf32>
    %22 = vector.extract_strided_slice %9 {offsets = [0, 64], sizes = [4, 32], strides = [1, 1]} : vector<4x128xf32> to vector<4x32xf32>
    %23 = math.tanh %22 : vector<4x32xf32>
    %24 = vector.extract_strided_slice %9 {offsets = [0, 96], sizes = [4, 32], strides = [1, 1]} : vector<4x128xf32> to vector<4x32xf32>
    %25 = arith.negf %24 : vector<4x32xf32>
    %26 = math.exp %25 : vector<4x32xf32>
    %cst_16 = arith.constant 1.000000e+00 : f32
    %27 = vector.broadcast %cst_16 : f32 to vector<4x32xf32>
    %28 = arith.addf %27, %26 : vector<4x32xf32>
    %29 = arith.divf %27, %28 : vector<4x32xf32>
    %c0_17 = arith.constant 0 : index
    %c0_18 = arith.constant 0 : index
    %30 = vector.load %arg6[%c0_17, %c0_18] : memref<4x32xf32, #tpu.memory_space<vmem>>, vector<4x32xf32>
    %31 = arith.mulf %21, %30 : vector<4x32xf32>
    %32 = arith.mulf %15, %23 : vector<4x32xf32>
    %33 = arith.addf %31, %32 : vector<4x32xf32>
    %34 = math.tanh %33 : vector<4x32xf32>
    %35 = arith.mulf %29, %34 : vector<4x32xf32>
    %c0_19 = arith.constant 0 : index
    %c0_20 = arith.constant 0 : index
    %36 = vector.load %arg6[%c0_19, %c0_20] : memref<4x32xf32, #tpu.memory_space<vmem>>, vector<4x32xf32>
    tpu.vector_store %arg6[%c0_19, %c0_20], %33 {strides = array<i32>} : memref<4x32xf32, #tpu.memory_space<vmem>>, vector<4x32xf32>,
    %c0_21 = arith.constant 0 : index
    %c0_22 = arith.constant 0 : index
    %37 = vector.load %arg5[%c0_21, %c0_22] : memref<4x32xf32, #tpu.memory_space<vmem>>, vector<4x32xf32>
    tpu.vector_store %arg5[%c0_21, %c0_22], %35 {strides = array<i32>} : memref<4x32xf32, #tpu.memory_space<vmem>>, vector<4x32xf32>,
    %c0_23 = arith.constant 0 : index
    %c0_24 = arith.constant 0 : index
    %c0_25 = arith.constant 0 : index
    %38 = vector.load %arg4[%c0_23, %c0_24, %c0_25] : memref<4x4x32xf32, #tpu.memory_space<vmem>>, vector<1x4x32xf32>
    %39 = vector.shape_cast %38 : vector<1x4x32xf32> to vector<4x32xf32>
    %40 = vector.shape_cast %35 : vector<4x32xf32> to vector<1x4x32xf32>
    tpu.vector_store %arg4[%c0_23, %c0_24, %c0_25], %40 {strides = array<i32>} : memref<4x4x32xf32, #tpu.memory_space<vmem>>, vector<1x4x32xf32>,
    %c0_26 = arith.constant 0 : index
    %c0_27 = arith.constant 0 : index
    %41 = vector.load %arg5[%c0_26, %c0_27] : memref<4x32xf32, #tpu.memory_space<vmem>>, vector<4x32xf32>
    %c0_28 = arith.constant 0 : index
    %c0_29 = arith.constant 0 : index
    %42 = vector.load %arg3[%c0_28, %c0_29] : memref<32x128xf32, #tpu.memory_space<vmem>>, vector<32x128xf32>
    %cst_30 = arith.constant dense<0.000000e+00> : vector<4x128xf32>
    %43 = tpu.matmul %41, %42, %cst_30 {dimension_numbers = #tpu.dot_dimension_numbers<[1], [0], [0], [1], [0, 0, 1, 1], [], []>} : vector<4x32xf32>, vector<32x128xf32>, vector<4x128xf32> -> vector<4x128xf32>
    %c1 = arith.constant 1 : index
    %c0_31 = arith.constant 0 : index
    %c0_32 = arith.constant 0 : index
    %44 = vector.load %arg1[%c1, %c0_31, %c0_32] : memref<4x4x128xf32, #tpu.memory_space<vmem>>, vector<1x4x128xf32>
    %45 = vector.shape_cast %44 : vector<1x4x128xf32> to vector<4x128xf32>
    %46 = arith.addf %43, %45 : vector<4x128xf32>
    %47 = vector.extract_strided_slice %46 {offsets = [0, 0], sizes = [4, 32], strides = [1, 1]} : vector<4x128xf32> to vector<4x32xf32>
    %48 = arith.negf %47 : vector<4x32xf32>
    %49 = math.exp %48 : vector<4x32xf32>
    %cst_33 = arith.constant 1.000000e+00 : f32
    %50 = vector.broadcast %cst_33 : f32 to vector<4x32xf32>
    %51 = arith.addf %50, %49 : vector<4x32xf32>
    %52 = arith.divf %50, %51 : vector<4x32xf32>
    %53 = vector.extract_strided_slice %46 {offsets = [0, 32], sizes = [4, 32], strides = [1, 1]} : vector<4x128xf32> to vector<4x32xf32>
    %54 = arith.negf %53 : vector<4x32xf32>
    %55 = math.exp %54 : vector<4x32xf32>
    %cst_34 = arith.constant 1.000000e+00 : f32
    %56 = vector.broadcast %cst_34 : f32 to vector<4x32xf32>
    %57 = arith.addf %56, %55 : vector<4x32xf32>
    %58 = arith.divf %56, %57 : vector<4x32xf32>
    %59 = vector.extract_strided_slice %46 {offsets = [0, 64], sizes = [4, 32], strides = [1, 1]} : vector<4x128xf32> to vector<4x32xf32>
    %60 = math.tanh %59 : vector<4x32xf32>
    %61 = vector.extract_strided_slice %46 {offsets = [0, 96], sizes = [4, 32], strides = [1, 1]} : vector<4x128xf32> to vector<4x32xf32>
    %62 = arith.negf %61 : vector<4x32xf32>
    %63 = math.exp %62 : vector<4x32xf32>
    %cst_35 = arith.constant 1.000000e+00 : f32
    %64 = vector.broadcast %cst_35 : f32 to vector<4x32xf32>
    %65 = arith.addf %64, %63 : vector<4x32xf32>
    %66 = arith.divf %64, %65 : vector<4x32xf32>
    %c0_36 = arith.constant 0 : index
    %c0_37 = arith.constant 0 : index
    %67 = vector.load %arg6[%c0_36, %c0_37] : memref<4x32xf32, #tpu.memory_space<vmem>>, vector<4x32xf32>
    %68 = arith.mulf %58, %67 : vector<4x32xf32>
    %69 = arith.mulf %52, %60 : vector<4x32xf32>
    %70 = arith.addf %68, %69 : vector<4x32xf32>
    %71 = math.tanh %70 : vector<4x32xf32>
    %72 = arith.mulf %66, %71 : vector<4x32xf32>
    %c0_38 = arith.constant 0 : index
    %c0_39 = arith.constant 0 : index
    %73 = vector.load %arg6[%c0_38, %c0_39] : memref<4x32xf32, #tpu.memory_space<vmem>>, vector<4x32xf32>
    tpu.vector_store %arg6[%c0_38, %c0_39], %70 {strides = array<i32>} : memref<4x32xf32, #tpu.memory_space<vmem>>, vector<4x32xf32>,
    %c0_40 = arith.constant 0 : index
    %c0_41 = arith.constant 0 : index
    %74 = vector.load %arg5[%c0_40, %c0_41] : memref<4x32xf32, #tpu.memory_space<vmem>>, vector<4x32xf32>
    tpu.vector_store %arg5[%c0_40, %c0_41], %72 {strides = array<i32>} : memref<4x32xf32, #tpu.memory_space<vmem>>, vector<4x32xf32>,
    %c1_42 = arith.constant 1 : index
    %c0_43 = arith.constant 0 : index
    %c0_44 = arith.constant 0 : index
    %75 = vector.load %arg4[%c1_42, %c0_43, %c0_44] : memref<4x4x32xf32, #tpu.memory_space<vmem>>, vector<1x4x32xf32>
    %76 = vector.shape_cast %75 : vector<1x4x32xf32> to vector<4x32xf32>
    %77 = vector.shape_cast %72 : vector<4x32xf32> to vector<1x4x32xf32>
    tpu.vector_store %arg4[%c1_42, %c0_43, %c0_44], %77 {strides = array<i32>} : memref<4x4x32xf32, #tpu.memory_space<vmem>>, vector<1x4x32xf32>,
    %c0_45 = arith.constant 0 : index
    %c0_46 = arith.constant 0 : index
    %78 = vector.load %arg5[%c0_45, %c0_46] : memref<4x32xf32, #tpu.memory_space<vmem>>, vector<4x32xf32>
    %c0_47 = arith.constant 0 : index
    %c0_48 = arith.constant 0 : index
    %79 = vector.load %arg3[%c0_47, %c0_48] : memref<32x128xf32, #tpu.memory_space<vmem>>, vector<32x128xf32>
    %cst_49 = arith.constant dense<0.000000e+00> : vector<4x128xf32>
    %80 = tpu.matmul %78, %79, %cst_49 {dimension_numbers = #tpu.dot_dimension_numbers<[1], [0], [0], [1], [0, 0, 1, 1], [], []>} : vector<4x32xf32>, vector<32x128xf32>, vector<4x128xf32> -> vector<4x128xf32>
    %c2 = arith.constant 2 : index
    %c0_50 = arith.constant 0 : index
    %c0_51 = arith.constant 0 : index
    %81 = vector.load %arg1[%c2, %c0_50, %c0_51] : memref<4x4x128xf32, #tpu.memory_space<vmem>>, vector<1x4x128xf32>
    %82 = vector.shape_cast %81 : vector<1x4x128xf32> to vector<4x128xf32>
    %83 = arith.addf %80, %82 : vector<4x128xf32>
    %84 = vector.extract_strided_slice %83 {offsets = [0, 0], sizes = [4, 32], strides = [1, 1]} : vector<4x128xf32> to vector<4x32xf32>
    %85 = arith.negf %84 : vector<4x32xf32>
    %86 = math.exp %85 : vector<4x32xf32>
    %cst_52 = arith.constant 1.000000e+00 : f32
    %87 = vector.broadcast %cst_52 : f32 to vector<4x32xf32>
    %88 = arith.addf %87, %86 : vector<4x32xf32>
    %89 = arith.divf %87, %88 : vector<4x32xf32>
    %90 = vector.extract_strided_slice %83 {offsets = [0, 32], sizes = [4, 32], strides = [1, 1]} : vector<4x128xf32> to vector<4x32xf32>
    %91 = arith.negf %90 : vector<4x32xf32>
    %92 = math.exp %91 : vector<4x32xf32>
    %cst_53 = arith.constant 1.000000e+00 : f32
    %93 = vector.broadcast %cst_53 : f32 to vector<4x32xf32>
    %94 = arith.addf %93, %92 : vector<4x32xf32>
    %95 = arith.divf %93, %94 : vector<4x32xf32>
    %96 = vector.extract_strided_slice %83 {offsets = [0, 64], sizes = [4, 32], strides = [1, 1]} : vector<4x128xf32> to vector<4x32xf32>
    %97 = math.tanh %96 : vector<4x32xf32>
    %98 = vector.extract_strided_slice %83 {offsets = [0, 96], sizes = [4, 32], strides = [1, 1]} : vector<4x128xf32> to vector<4x32xf32>
    %99 = arith.negf %98 : vector<4x32xf32>
    %100 = math.exp %99 : vector<4x32xf32>
    %cst_54 = arith.constant 1.000000e+00 : f32
    %101 = vector.broadcast %cst_54 : f32 to vector<4x32xf32>
    %102 = arith.addf %101, %100 : vector<4x32xf32>
    %103 = arith.divf %101, %102 : vector<4x32xf32>
    %c0_55 = arith.constant 0 : index
    %c0_56 = arith.constant 0 : index
    %104 = vector.load %arg6[%c0_55, %c0_56] : memref<4x32xf32, #tpu.memory_space<vmem>>, vector<4x32xf32>
    %105 = arith.mulf %95, %104 : vector<4x32xf32>
    %106 = arith.mulf %89, %97 : vector<4x32xf32>
    %107 = arith.addf %105, %106 : vector<4x32xf32>
    %108 = math.tanh %107 : vector<4x32xf32>
    %109 = arith.mulf %103, %108 : vector<4x32xf32>
    %c0_57 = arith.constant 0 : index
    %c0_58 = arith.constant 0 : index
    %110 = vector.load %arg6[%c0_57, %c0_58] : memref<4x32xf32, #tpu.memory_space<vmem>>, vector<4x32xf32>
    tpu.vector_store %arg6[%c0_57, %c0_58], %107 {strides = array<i32>} : memref<4x32xf32, #tpu.memory_space<vmem>>, vector<4x32xf32>,
    %c0_59 = arith.constant 0 : index
    %c0_60 = arith.constant 0 : index
    %111 = vector.load %arg5[%c0_59, %c0_60] : memref<4x32xf32, #tpu.memory_space<vmem>>, vector<4x32xf32>
    tpu.vector_store %arg5[%c0_59, %c0_60], %109 {strides = array<i32>} : memref<4x32xf32, #tpu.memory_space<vmem>>, vector<4x32xf32>,
    %c2_61 = arith.constant 2 : index
    %c0_62 = arith.constant 0 : index
    %c0_63 = arith.constant 0 : index
    %112 = vector.load %arg4[%c2_61, %c0_62, %c0_63] : memref<4x4x32xf32, #tpu.memory_space<vmem>>, vector<1x4x32xf32>
    %113 = vector.shape_cast %112 : vector<1x4x32xf32> to vector<4x32xf32>
    %114 = vector.shape_cast %109 : vector<4x32xf32> to vector<1x4x32xf32>
    tpu.vector_store %arg4[%c2_61, %c0_62, %c0_63], %114 {strides = array<i32>} : memref<4x4x32xf32, #tpu.memory_space<vmem>>, vector<1x4x32xf32>,
    %c0_64 = arith.constant 0 : index
    %c0_65 = arith.constant 0 : index
    %115 = vector.load %arg5[%c0_64, %c0_65] : memref<4x32xf32, #tpu.memory_space<vmem>>, vector<4x32xf32>
    %c0_66 = arith.constant 0 : index
    %c0_67 = arith.constant 0 : index
    %116 = vector.load %arg3[%c0_66, %c0_67] : memref<32x128xf32, #tpu.memory_space<vmem>>, vector<32x128xf32>
    %cst_68 = arith.constant dense<0.000000e+00> : vector<4x128xf32>
    %117 = tpu.matmul %115, %116, %cst_68 {dimension_numbers = #tpu.dot_dimension_numbers<[1], [0], [0], [1], [0, 0, 1, 1], [], []>} : vector<4x32xf32>, vector<32x128xf32>, vector<4x128xf32> -> vector<4x128xf32>
    %c3 = arith.constant 3 : index
    %c0_69 = arith.constant 0 : index
    %c0_70 = arith.constant 0 : index
    %118 = vector.load %arg1[%c3, %c0_69, %c0_70] : memref<4x4x128xf32, #tpu.memory_space<vmem>>, vector<1x4x128xf32>
    %119 = vector.shape_cast %118 : vector<1x4x128xf32> to vector<4x128xf32>
    %120 = arith.addf %117, %119 : vector<4x128xf32>
    %121 = vector.extract_strided_slice %120 {offsets = [0, 0], sizes = [4, 32], strides = [1, 1]} : vector<4x128xf32> to vector<4x32xf32>
    %122 = arith.negf %121 : vector<4x32xf32>
    %123 = math.exp %122 : vector<4x32xf32>
    %cst_71 = arith.constant 1.000000e+00 : f32
    %124 = vector.broadcast %cst_71 : f32 to vector<4x32xf32>
    %125 = arith.addf %124, %123 : vector<4x32xf32>
    %126 = arith.divf %124, %125 : vector<4x32xf32>
    %127 = vector.extract_strided_slice %120 {offsets = [0, 32], sizes = [4, 32], strides = [1, 1]} : vector<4x128xf32> to vector<4x32xf32>
    %128 = arith.negf %127 : vector<4x32xf32>
    %129 = math.exp %128 : vector<4x32xf32>
    %cst_72 = arith.constant 1.000000e+00 : f32
    %130 = vector.broadcast %cst_72 : f32 to vector<4x32xf32>
    %131 = arith.addf %130, %129 : vector<4x32xf32>
    %132 = arith.divf %130, %131 : vector<4x32xf32>
    %133 = vector.extract_strided_slice %120 {offsets = [0, 64], sizes = [4, 32], strides = [1, 1]} : vector<4x128xf32> to vector<4x32xf32>
    %134 = math.tanh %133 : vector<4x32xf32>
    %135 = vector.extract_strided_slice %120 {offsets = [0, 96], sizes = [4, 32], strides = [1, 1]} : vector<4x128xf32> to vector<4x32xf32>
    %136 = arith.negf %135 : vector<4x32xf32>
    %137 = math.exp %136 : vector<4x32xf32>
    %cst_73 = arith.constant 1.000000e+00 : f32
    %138 = vector.broadcast %cst_73 : f32 to vector<4x32xf32>
    %139 = arith.addf %138, %137 : vector<4x32xf32>
    %140 = arith.divf %138, %139 : vector<4x32xf32>
    %c0_74 = arith.constant 0 : index
    %c0_75 = arith.constant 0 : index
    %141 = vector.load %arg6[%c0_74, %c0_75] : memref<4x32xf32, #tpu.memory_space<vmem>>, vector<4x32xf32>
    %142 = arith.mulf %132, %141 : vector<4x32xf32>
    %143 = arith.mulf %126, %134 : vector<4x32xf32>
    %144 = arith.addf %142, %143 : vector<4x32xf32>
    %145 = math.tanh %144 : vector<4x32xf32>
    %146 = arith.mulf %140, %145 : vector<4x32xf32>
    %c0_76 = arith.constant 0 : index
    %c0_77 = arith.constant 0 : index
    %147 = vector.load %arg6[%c0_76, %c0_77] : memref<4x32xf32, #tpu.memory_space<vmem>>, vector<4x32xf32>
    tpu.vector_store %arg6[%c0_76, %c0_77], %144 {strides = array<i32>} : memref<4x32xf32, #tpu.memory_space<vmem>>, vector<4x32xf32>,
    %c0_78 = arith.constant 0 : index
    %c0_79 = arith.constant 0 : index
    %148 = vector.load %arg5[%c0_78, %c0_79] : memref<4x32xf32, #tpu.memory_space<vmem>>, vector<4x32xf32>
    tpu.vector_store %arg5[%c0_78, %c0_79], %146 {strides = array<i32>} : memref<4x32xf32, #tpu.memory_space<vmem>>, vector<4x32xf32>,
    %c3_80 = arith.constant 3 : index
    %c0_81 = arith.constant 0 : index
    %c0_82 = arith.constant 0 : index
    %149 = vector.load %arg4[%c3_80, %c0_81, %c0_82] : memref<4x4x32xf32, #tpu.memory_space<vmem>>, vector<1x4x32xf32>
    %150 = vector.shape_cast %149 : vector<1x4x32xf32> to vector<4x32xf32>
    %151 = vector.shape_cast %146 : vector<4x32xf32> to vector<1x4x32xf32>
    tpu.vector_store %arg4[%c3_80, %c0_81, %c0_82], %151 {strides = array<i32>} : memref<4x4x32xf32, #tpu.memory_space<vmem>>, vector<1x4x32xf32>,
    return
  }
  func.func @transform_0(%arg0: i32) -> (i32, i32, i32) {
    %c0_i32 = arith.constant 0 : i32
    %c0_i32_0 = arith.constant 0 : i32
    %c0_i32_1 = arith.constant 0 : i32
    %c0_i32_2 = arith.constant 0 : i32
    return %c0_i32, %c0_i32_0, %c0_i32_1 : i32, i32, i32
  }
  func.func @transform_1(%arg0: i32) -> (i32, i32) {
    %c0_i32 = arith.constant 0 : i32
    %c0_i32_0 = arith.constant 0 : i32
    %c0_i32_1 = arith.constant 0 : i32
    return %c0_i32, %c0_i32_0 : i32, i32
  }
  func.func @transform_2(%arg0: i32) -> (i32, i32) {
    %c0_i32 = arith.constant 0 : i32
    %c0_i32_0 = arith.constant 0 : i32
    %c0_i32_1 = arith.constant 0 : i32
    return %c0_i32, %c0_i32_0 : i32, i32
  }
  func.func @transform_3(%arg0: i32) -> (i32, i32, i32) {
    %c0_i32 = arith.constant 0 : i32
    %c0_i32_0 = arith.constant 0 : i32
    %c0_i32_1 = arith.constant 0 : i32
    %c0_i32_2 = arith.constant 0 : i32
    return %c0_i32, %c0_i32_0, %c0_i32_1 : i32, i32, i32
  }
}

</mosaic_0001>

<bundles_post_ra>
// kernel: tpu_custom_call.1
= control target key start
LH: loop header
LB: loop body
LE: loop exit
PB: predicated region body
PF: predicated region fallthrough
CT: control target
= control target key end

     0   :  { %8 = vsyncpa [#allocation5], 0  ;;  %s662_s0 = inlined_call_operand.hbm [shape: f32[4,4,128], index: 0, kind: input, shape index: {}]   ;;  %s663_s1 = inlined_call_operand.hbm [shape: f32[4,32], index: 1, kind: input, shape index: {}]   ;;  %s664_s2 = inlined_call_operand.hbm [shape: f32[32,128], index: 2, kind: input, shape index: {}]   ;;  %s665_s3 = inlined_call_operand.hbm [shape: f32[4,4,32], index: 3, kind: output, shape index: {}]  }
   0x1   :  { %9 = vsyncpa [#allocation8], 0  ;;  %s29_s14 = sshll.u32 %s663_s1, 4  ;;  %s30_s14 = int_to_ptr.hbm [resolvable:$true] %s29_s14 }
   0x2   :  { %10 = vsyncpa [#allocation6], 0  ;;  %s572_s15 = smov [#allocation7]   ;;  %s15_s19 = sshll.u32 %s662_s0, 4  ;;  %s16_s19 = int_to_ptr.hbm [resolvable:$true] %s15_s19 }
   0x3   :  { %s31_s16 = sshll.u32 %s572_s15, 4  ;;  %s573_s20 = smov [#allocation4]   ;;  %s32_s16 = int_to_ptr.vmem [resolvable:$true] %s31_s16 }
   0x4   :  { %34 = dma.hbm_to_vmem [thread:$0]  %s30_s14, 64, %s32_s16, [#allocation8]  }
   0x5   :  { %s17_s21 = sshll.u32 %s573_s20, 4  ;;  %s574_s22 = smov 64   ;;  %s18_s21 = int_to_ptr.vmem [resolvable:$true] %s17_s21 }
   0x6   :  { %s575_s23 = smov 4   ;;  %s39_s25 = sshll.u32 %s664_s2, 4  ;;  %s40_s25 = int_to_ptr.hbm [resolvable:$true] %s39_s25 }
   0x7   :  { %23 = dma.hbm_to_vmem [thread:$0]  %s16_s19, 256, %s18_s21, [#allocation5], %s574_s22, %s574_s22, %s575_s23  }
   0x8   :  { %s576_s26 = smov [#allocation9]   ;;  %s577_s0 = smov 128  }
   0x9   :  { %s41_s27 = sshll.u32 %s576_s26, 4  ;;  %s578_s28 = smov 8   ;;  %s42_s27 = int_to_ptr.vmem [resolvable:$true] %s41_s27 }
   0xa   :  { %47 = dma.hbm_to_vmem [thread:$0]  %s40_s25, 512, %s42_s27, [#allocation8], %s577_s0, %s577_s0, %s578_s28  }
   0xb   :  { %566 = dma.done.wait [#allocation5], 256  }
   0xc   :  { %567 = vsyncadd [#allocation5], 4294967040 }
   0xd   :  { %568 = dma.done.wait [#allocation8], 576  }
   0xe   :  { %569 = vsyncadd [#allocation8], 4294966720  ;;  %vm61_vm0 = vcmask 257024   ;;  %v69_v0 = vld [vmem:[#allocation9 + $0x18] sm:$0xff]  ;;  %v68_v1 = vld [vmem:[#allocation9 + $0x10] sm:$0xff]  ;;  %vm71_vm1 = vcmask 261120  }
   0xf   :  { %87 = vmatpush.msra.mxu0 %v69_v0  ;;  %v60_v2 = vld [vmem:[#allocation7] sm:$0xf]  ;;  %170 = vmatpush.msra.mxu1 %v69_v0  ;;  %v67_v3 = vld [vmem:[#allocation9 + $0x8] sm:$0xff]  ;;  %v66_v4 = vld [vmem:[#allocation9] sm:$0xff]  ;;  %s579_s2 = smov 32   ;;  %s580_s29 = smov 96  }
  0x10   :  { %62 = vst.msk [vmem:[#allocation2] sm:$0xf] %vm61_vm0, %v60_v2  ;;  %254 = vmatpush.msra.mxu2 %v69_v0  ;;  %338 = vmatpush.msra.mxu3 %v69_v0  ;;  %v63_v6 = vld [vmem:[#allocation7] sm:$0xf]  ;;  %v70_v7 = vld [vmem:[#allocation4] sm:$0xf] }
  0x11   :  { %88 = vmatpush.msra.mxu0 %v68_v1  ;;  %171 = vmatpush.msra.mxu1 %v68_v1  ;;  %64 = vst.msk [vmem:[#allocation3] sm:$0xf] %vm61_vm0, %v63_v6  ;;  %v154_v38 = vld [vmem:[#allocation4 + $0x4] sm:$0xf]  ;;  %s581_s30 = smov [#allocation10]   ;;  %s406_s7 = sshll.u32 %s665_s3, 4  ;;  %s407_s7 = int_to_ptr.hbm [resolvable:$true] %s406_s7 }
  0x12   :  { %255 = vmatpush.msra.mxu2 %v68_v1  ;;  %339 = vmatpush.msra.mxu3 %v68_v1  ;;  %s404_s4 = sshll.u32 %s581_s30, 4  ;;  %s405_s4 = int_to_ptr.vmem [resolvable:$true] %s404_s4 }
  0x13   :  { %89 = vmatpush.msra.mxu0 %v67_v3  ;;  %172 = vmatpush.msra.mxu1 %v67_v3 }
  0x14   :  { %256 = vmatpush.msra.mxu2 %v67_v3  ;;  %340 = vmatpush.msra.mxu3 %v67_v3 }
  0x15   :  { %90 = vmatpush.msra.mxu0 %v66_v4  ;;  %173 = vmatpush.msra.mxu1 %v66_v4 }
  0x16   :  { %257 = vmatpush.msra.mxu2 %v66_v4  ;;  %341 = vmatpush.msra.mxu3 %v66_v4  ;;  %v238_v4 = vld [vmem:[#allocation4 + $0x8] sm:$0xf] }
  0x17   :  { %v65_v5 = vld [vmem:[#allocation2] sm:$0xf] }
  0x18   :  { %420 = vmatmul.msk.f32.vlgmr.msra.gmra.mxu0 %vm71_vm1, %v65_v5  ;;  %v115_v11 = vld [vmem:[#allocation3] sm:$0xf] }
  0x95   :  { %v92_v8 = vpop.f32.mrf.mxu0 }
  0x96   :  { %v93_v9 = vadd.f32 %v92_v8, %v70_v7 }
  0x98   :  { %438 = vtanh.f32 %v93_v9  ;;  %v421_v12 = vmul.f32 -1.442695, %v93_v9 }
  0x9a   :  { %440 = vpow2.f32 %v421_v12 }
  0x9e   :  { %v439_v10 = vpop.eup %438 }
  0x9f   :  { %122 = vrot.lane.b32.xlu0 %v439_v10, %s574_s22 }
  0xa0   :  { %v441_v13 = vpop.eup %440 }
  0xa1   :  { %v98_v14 = vadd.f32 1.0, %v441_v13 }
  0xa3   :  { %442 = vrcp.f32 %v98_v14  ;;  %v110_v20 = vand.u32 2147483648, %v98_v14  ;;  %vm104_vm3 = vweird.f32 %v98_v14  ;;  %v108_v21 = vand.u32 2147483647, %v98_v14 }
  0xa5   :  { %v111_v23 = vor.u32 1.1754944e-38, %v110_v20  ;;  %vm109_vm5 = vcmp.eq.f32.partialorder %v108_v21, 8.507059e+37 }
  0xa7   :  { %117 = vrot.lane.b32.xlu0 %v115_v11, %s579_s2 }
  0xa9   :  { %v443_v15 = vpop.eup %442 }
  0xaa   :  { %v100_v16 = vmul.f32 %v443_v15, %v98_v14  ;;  %vm105_vm2 = vweird.f32 %v443_v15 }
  0xab   :  { %vm106_vm4 = vmor %vm104_vm3, %vm105_vm2 }
  0xac   :  { %v101_v17 = vsub.f32 1.0, %v100_v16 }
  0xae   :  { %v102_v18 = vmul.f32 %v443_v15, %v101_v17 }
  0xb0   :  { %v103_v19 = vadd.f32 %v443_v15, %v102_v18 }
  0xb2   :  { %v107_v22 = vsel %vm106_vm4, %v443_v15, %v103_v19 }
  0xb3   :  { %v112_v25 = vsel %vm109_vm5, %v111_v23, %v107_v22 }
 0x111   :  { %v123_v24 = vpop.permute.xlu0 %122 }
 0x112   :  { %v125_v26 = vmul.f32 %v123_v24, %v112_v25 }
 0x114   :  { %127 = vrot.lane.b32.xlu1 %v125_v26, %s579_s2 }
 0x119   :  { %v118_v27 = vpop.permute.xlu0 %117 }
 0x11a   :  { %v120_v28 = vmul.f32 %v118_v27, %v112_v25 }
 0x186   :  { %v128_v29 = vpop.permute.xlu1 %127 }
 0x187   :  { %v130_v30 = vadd.f32 %v128_v29, %v120_v28 }
 0x189   :  { %444 = vtanh.f32 %v130_v30 }
 0x18f   :  { %v445_v31 = vpop.eup %444 }
 0x190   :  { %133 = vrot.lane.b32.xlu1 %v445_v31, %s574_s22 }
 0x202   :  { %v134_v32 = vpop.permute.xlu1 %133 }
 0x203   :  { %v136_v33 = vmul.f32 %v134_v32, %v112_v25 }
 0x205   :  { %143 = vrot.lane.b32.xlu2 %v136_v33, %s579_s2 }
 0x20d   :  { %138 = vrot.lane.b32.xlu2 %v130_v30, %s580_s29 }
 0x25f   :  { %v144_v34 = vpop.permute.xlu2 %143 }
 0x260   :  { %146 = vst.msk [vmem:[#allocation2] sm:$0xf] %vm61_vm0, %v144_v34 }
 0x261   :  { %147 = vst.msk [vmem:[#allocation10] sm:$0xf] %vm61_vm0, %v144_v34  ;;  %v322_v34 = vld [vmem:[#allocation4 + $0xc] sm:$0xf] }
 0x267   :  { %v139_v35 = vpop.permute.xlu2 %138  ;;  %v148_v36 = vld [vmem:[#allocation2] sm:$0xf] }
 0x268   :  { %141 = vst.msk [vmem:[#allocation3] sm:$0xf] %vm61_vm0, %v139_v35  ;;  %422 = vmatmul.msk.f32.vlgmr.msra.gmra.mxu1 %vm71_vm1, %v148_v36 }
 0x26f   :  { %v198_v37 = vld [vmem:[#allocation3] sm:$0xf] }
 0x270   :  { %200 = vrot.lane.b32.xlu1 %v198_v37, %s579_s2 }
 0x2e2   :  { %v201_v57 = vpop.permute.xlu1 %200 }
 0x2e5   :  { %v175_v39 = vpop.f32.mrf.mxu1 }
 0x2e6   :  { %v176_v40 = vadd.f32 %v175_v39, %v154_v38 }
 0x2e8   :  { %446 = vtanh.f32 %v176_v40  ;;  %v423_v42 = vmul.f32 -1.442695, %v176_v40 }
 0x2ea   :  { %448 = vpow2.f32 %v423_v42 }
 0x2ee   :  { %v447_v41 = vpop.eup %446 }
 0x2ef   :  { %205 = vrot.lane.b32.xlu0 %v447_v41, %s574_s22 }
 0x2f0   :  { %v449_v43 = vpop.eup %448 }
 0x2f1   :  { %v181_v44 = vadd.f32 1.0, %v449_v43 }
 0x2f3   :  { %450 = vrcp.f32 %v181_v44  ;;  %v193_v50 = vand.u32 2147483648, %v181_v44  ;;  %vm187_vm7 = vweird.f32 %v181_v44  ;;  %v191_v51 = vand.u32 2147483647, %v181_v44 }
 0x2f5   :  { %v194_v53 = vor.u32 1.1754944e-38, %v193_v50  ;;  %vm192_vm9 = vcmp.eq.f32.partialorder %v191_v51, 8.507059e+37 }
 0x2f9   :  { %v451_v45 = vpop.eup %450 }
 0x2fa   :  { %v183_v46 = vmul.f32 %v451_v45, %v181_v44  ;;  %vm188_vm6 = vweird.f32 %v451_v45 }
 0x2fb   :  { %vm189_vm8 = vmor %vm187_vm7, %vm188_vm6 }
 0x2fc   :  { %v184_v47 = vsub.f32 1.0, %v183_v46 }
 0x2fe   :  { %v185_v48 = vmul.f32 %v451_v45, %v184_v47 }
 0x300   :  { %v186_v49 = vadd.f32 %v451_v45, %v185_v48 }
 0x302   :  { %v190_v52 = vsel %vm189_vm8, %v451_v45, %v186_v49 }
 0x303   :  { %v195_v55 = vsel %vm192_vm9, %v194_v53, %v190_v52 }
 0x304   :  { %v203_v58 = vmul.f32 %v201_v57, %v195_v55 }
 0x361   :  { %v206_v54 = vpop.permute.xlu0 %205 }
 0x362   :  { %v208_v56 = vmul.f32 %v206_v54, %v195_v55 }
 0x364   :  { %210 = vrot.lane.b32.xlu2 %v208_v56, %s579_s2 }
 0x3be   :  { %v211_v59 = vpop.permute.xlu2 %210 }
 0x3bf   :  { %v213_v60 = vadd.f32 %v211_v59, %v203_v58 }
 0x3c1   :  { %452 = vtanh.f32 %v213_v60  ;;  %221 = vrot.lane.b32.xlu2 %v213_v60, %s580_s29 }
 0x3c7   :  { %v453_v61 = vpop.eup %452 }
 0x3c8   :  { %216 = vrot.lane.b32.xlu0 %v453_v61, %s574_s22 }
 0x41b   :  { %v222_v62 = vpop.permute.xlu2 %221 }
 0x41c   :  { %224 = vst.msk [vmem:[#allocation3] sm:$0xf] %vm61_vm0, %v222_v62 }
 0x423   :  { %v282_v1 = vld [vmem:[#allocation3] sm:$0xf] }
 0x43a   :  { %v217_v63 = vpop.permute.xlu0 %216 }
 0x43b   :  { %v219_v0 = vmul.f32 %v217_v63, %v195_v55 }
 0x43d   :  { %226 = vrot.lane.b32.xlu1 %v219_v0, %s579_s2 }
 0x445   :  { %284 = vrot.lane.b32.xlu1 %v282_v1, %s579_s2 }
 0x4af   :  { %v227_v2 = vpop.permute.xlu1 %226 }
 0x4b0   :  { %229 = vst.msk [vmem:[#allocation2] sm:$0xf] %vm61_vm0, %v227_v2 }
 0x4b1   :  { %231 = vst.msk [vmem:[#allocation10 + $0x4] sm:$0xf] %vm61_vm0, %v227_v2 }
 0x4b7   :  { %v232_v3 = vld [vmem:[#allocation2] sm:$0xf]  ;;  %v285_v23 = vpop.permute.xlu1 %284 }
 0x4b8   :  { %424 = vmatmul.msk.f32.vlgmr.msra.gmra.mxu2 %vm71_vm1, %v232_v3 }
 0x53b   :  { %v259_v5 = vpop.f32.mrf.mxu2 }
 0x53c   :  { %v260_v6 = vadd.f32 %v259_v5, %v238_v4 }
 0x53e   :  { %454 = vtanh.f32 %v260_v6  ;;  %v425_v8 = vmul.f32 -1.442695, %v260_v6 }
 0x540   :  { %456 = vpow2.f32 %v425_v8 }
 0x544   :  { %v455_v7 = vpop.eup %454 }
 0x545   :  { %289 = vrot.lane.b32.xlu0 %v455_v7, %s574_s22 }
 0x546   :  { %v457_v9 = vpop.eup %456 }
 0x547   :  { %v265_v10 = vadd.f32 1.0, %v457_v9 }
 0x549   :  { %458 = vrcp.f32 %v265_v10  ;;  %v277_v16 = vand.u32 2147483648, %v265_v10  ;;  %vm271_vm11 = vweird.f32 %v265_v10  ;;  %v275_v17 = vand.u32 2147483647, %v265_v10 }
 0x54b   :  { %v278_v19 = vor.u32 1.1754944e-38, %v277_v16  ;;  %vm276_vm13 = vcmp.eq.f32.partialorder %v275_v17, 8.507059e+37 }
 0x54f   :  { %v459_v11 = vpop.eup %458 }
 0x550   :  { %v267_v12 = vmul.f32 %v459_v11, %v265_v10  ;;  %vm272_vm10 = vweird.f32 %v459_v11 }
 0x551   :  { %vm273_vm12 = vmor %vm271_vm11, %vm272_vm10 }
 0x552   :  { %v268_v13 = vsub.f32 1.0, %v267_v12 }
 0x554   :  { %v269_v14 = vmul.f32 %v459_v11, %v268_v13 }
 0x556   :  { %v270_v15 = vadd.f32 %v459_v11, %v269_v14 }
 0x558   :  { %v274_v18 = vsel %vm273_vm12, %v459_v11, %v270_v15 }
 0x559   :  { %v279_v21 = vsel %vm276_vm13, %v278_v19, %v274_v18 }
 0x55a   :  { %v287_v24 = vmul.f32 %v285_v23, %v279_v21 }
 0x5b7   :  { %v290_v20 = vpop.permute.xlu0 %289 }
 0x5b8   :  { %v292_v22 = vmul.f32 %v290_v20, %v279_v21 }
 0x5ba   :  { %294 = vrot.lane.b32.xlu2 %v292_v22, %s579_s2 }
 0x614   :  { %v295_v25 = vpop.permute.xlu2 %294 }
 0x615   :  { %v297_v26 = vadd.f32 %v295_v25, %v287_v24 }
 0x617   :  { %460 = vtanh.f32 %v297_v26  ;;  %305 = vrot.lane.b32.xlu2 %v297_v26, %s580_s29 }
 0x61d   :  { %v461_v27 = vpop.eup %460 }
 0x61e   :  { %300 = vrot.lane.b32.xlu0 %v461_v27, %s574_s22 }
 0x671   :  { %v306_v28 = vpop.permute.xlu2 %305 }
 0x672   :  { %308 = vst.msk [vmem:[#allocation3] sm:$0xf] %vm61_vm0, %v306_v28 }
 0x679   :  { %v366_v31 = vld [vmem:[#allocation3] sm:$0xf] }
 0x690   :  { %v301_v29 = vpop.permute.xlu0 %300 }
 0x691   :  { %v303_v30 = vmul.f32 %v301_v29, %v279_v21 }
 0x693   :  { %310 = vrot.lane.b32.xlu1 %v303_v30, %s579_s2 }
 0x69b   :  { %368 = vrot.lane.b32.xlu1 %v366_v31, %s579_s2 }
 0x705   :  { %v311_v32 = vpop.permute.xlu1 %310 }
 0x706   :  { %313 = vst.msk [vmem:[#allocation2] sm:$0xf] %vm61_vm0, %v311_v32 }
 0x707   :  { %315 = vst.msk [vmem:[#allocation10 + $0x8] sm:$0xf] %vm61_vm0, %v311_v32 }
 0x70d   :  { %v316_v33 = vld [vmem:[#allocation2] sm:$0xf]  ;;  %v369_v53 = vpop.permute.xlu1 %368 }
 0x70e   :  { %426 = vmatmul.msk.f32.vlgmr.msra.gmra.mxu3 %vm71_vm1, %v316_v33 }
 0x791   :  { %v343_v35 = vpop.f32.mrf.mxu3 }
 0x792   :  { %v344_v36 = vadd.f32 %v343_v35, %v322_v34 }
 0x794   :  { %462 = vtanh.f32 %v344_v36  ;;  %v427_v38 = vmul.f32 -1.442695, %v344_v36 }
 0x796   :  { %464 = vpow2.f32 %v427_v38 }
 0x79a   :  { %v463_v37 = vpop.eup %462 }
 0x79b   :  { %373 = vrot.lane.b32.xlu0 %v463_v37, %s574_s22 }
 0x79c   :  { %v465_v39 = vpop.eup %464 }
 0x79d   :  { %v349_v40 = vadd.f32 1.0, %v465_v39 }
 0x79f   :  { %466 = vrcp.f32 %v349_v40  ;;  %v361_v46 = vand.u32 2147483648, %v349_v40  ;;  %vm355_vm15 = vweird.f32 %v349_v40  ;;  %v359_v47 = vand.u32 2147483647, %v349_v40 }
 0x7a1   :  { %v362_v49 = vor.u32 1.1754944e-38, %v361_v46  ;;  %vm360_vm2 = vcmp.eq.f32.partialorder %v359_v47, 8.507059e+37 }
 0x7a5   :  { %v467_v41 = vpop.eup %466 }
 0x7a6   :  { %v351_v42 = vmul.f32 %v467_v41, %v349_v40  ;;  %vm356_vm14 = vweird.f32 %v467_v41 }
 0x7a7   :  { %vm357_vm1 = vmor %vm355_vm15, %vm356_vm14 }
 0x7a8   :  { %v352_v43 = vsub.f32 1.0, %v351_v42 }
 0x7aa   :  { %v353_v44 = vmul.f32 %v467_v41, %v352_v43 }
 0x7ac   :  { %v354_v45 = vadd.f32 %v467_v41, %v353_v44 }
 0x7ae   :  { %v358_v48 = vsel %vm357_vm1, %v467_v41, %v354_v45 }
 0x7af   :  { %v363_v51 = vsel %vm360_vm2, %v362_v49, %v358_v48 }
 0x7b0   :  { %v371_v54 = vmul.f32 %v369_v53, %v363_v51 }
 0x80d   :  { %v374_v50 = vpop.permute.xlu0 %373 }
 0x80e   :  { %v376_v52 = vmul.f32 %v374_v50, %v363_v51 }
 0x810   :  { %378 = vrot.lane.b32.xlu2 %v376_v52, %s579_s2 }
 0x86a   :  { %v379_v55 = vpop.permute.xlu2 %378 }
 0x86b   :  { %v381_v56 = vadd.f32 %v379_v55, %v371_v54 }
 0x86d   :  { %468 = vtanh.f32 %v381_v56  ;;  %389 = vrot.lane.b32.xlu2 %v381_v56, %s580_s29 }
 0x873   :  { %v469_v57 = vpop.eup %468 }
 0x874   :  { %384 = vrot.lane.b32.xlu0 %v469_v57, %s574_s22 }
 0x8c7   :  { %v390_v58 = vpop.permute.xlu2 %389 }
 0x8c8   :  { %392 = vst.msk [vmem:[#allocation3] sm:$0xf] %vm61_vm0, %v390_v58 }
 0x8e6   :  { %v385_v59 = vpop.permute.xlu0 %384 }
 0x8e7   :  { %v387_v60 = vmul.f32 %v385_v59, %v363_v51 }
 0x8e9   :  { %394 = vrot.lane.b32.xlu1 %v387_v60, %s579_s2 }
 0x95b   :  { %v395_v61 = vpop.permute.xlu1 %394 }
 0x95c   :  { %397 = vst.msk [vmem:[#allocation2] sm:$0xf] %vm61_vm0, %v395_v61 }
 0x95d   :  { %399 = vst.msk [vmem:[#allocation10 + $0xc] sm:$0xf] %vm61_vm0, %v395_v61 }
 0x95e   :  { %412 = dma.vmem_to_hbm [thread:$0]  %s405_s4, 256, %s407_s7, [#allocation6], %s574_s22, %s574_s22, %s575_s23  }
 0x95f   :  { %570 = dma.done.wait [#allocation6], 256  }
 0x960   :  { %571 = vsyncadd [#allocation6], 4294967040 }
 0x961   :  { %417 = vsyncpa [#allocation5], 1 }
 0x962   :  { %418 = vsyncpa [#allocation8], 1 }
 0x963   :  { %419 = vsyncpa [#allocation6], 1 }

</bundles_post_ra>
